<compile_context>
chip_gen: v5e
topology: v5e:2x2
jax: 0.10.0
libtpu: 0.0.40
codegen_flags: <defaults>
</compile_context>

<pallas_src>
import functools

import jax
import jax.numpy as jnp
from jax.experimental import pallas as pl
from jax.experimental.pallas import tpu as pltpu


def _concat_kernel(axis, *refs):
    """Body: load every input tile and emit ONE lane-dense full-block store."""
    out_ref = refs[-1]
    parts = [r[...] for r in refs[:-1]]
    out_ref[...] = jnp.concatenate(parts, axis=axis)


def _pick_tile(extent, unit, row_bytes, target_bytes=4 << 20, min_steps=8,
               parallel_grid=1):
    """Pick a tile size along one dimension.

    - multiple of `unit` (sublane/lane granule for the dtype) or the full extent
    - per-grid-step payload (tile * row_bytes) stays under `target_bytes` so the
      double-buffered footprint fits comfortably in VMEM on all generations
      (v7x only has 64 MiB)
    - shrink until there are >= min_steps pipelined grid steps, or we hit the
      hardware granule.
    """
    if extent <= unit:
        return extent
    tile = max(unit, min(extent, (target_bytes // max(row_bytes, 1)) // unit * unit))
    while tile > unit and parallel_grid * (-(-extent // tile)) < min_steps:
        tile = max(unit, (tile // 2) // unit * unit)
    return tile


def concat3d_pallas(tensors, axis):
    """Concatenate a list of [B, S, D] tensors along `axis` (1 or 2) on TPU."""
    assert axis in (1, 2)
    B = tensors[0].shape[0]
    dtype = tensors[0].dtype
    itemsize = jnp.dtype(dtype).itemsize
    # sublane packing granule: f32 -> 8, bf16 -> 16, int8/fp8 -> 32
    sub_unit = {4: 8, 2: 16, 1: 32}.get(itemsize, 8)

    if axis == 2:
        S = tensors[0].shape[1]
        assert all(t.shape[0] == B and t.shape[1] == S for t in tensors)
        d_out = sum(t.shape[2] for t in tensors)
        out_shape = (B, S, d_out)
        # Non-128-multiple feature widths would force masked stores / lane
        # relayout; XLA's native concat is already near-roofline there.
        if not all(t.shape[2] % 128 == 0 for t in tensors):
            return jnp.concatenate(tensors, axis=2)
        row_bytes = 2 * d_out * itemsize                  # inputs + output per seq row
        ts = _pick_tile(S, sub_unit, row_bytes, parallel_grid=B)
        grid = (B, -(-S // ts))
        in_specs = [pl.BlockSpec((1, ts, t.shape[2]), lambda b, s: (b, s, 0))
                    for t in tensors]
        out_specs = pl.BlockSpec((1, ts, d_out), lambda b, s: (b, s, 0))
    else:  # axis == 1
        D = tensors[0].shape[2]
        assert all(t.shape[0] == B and t.shape[2] == D for t in tensors)
        s_out = sum(t.shape[1] for t in tensors)
        out_shape = (B, s_out, D)
        if D % 128 != 0 or not all(t.shape[1] % sub_unit == 0 for t in tensors):
            return jnp.concatenate(tensors, axis=1)
        row_bytes = 2 * s_out * itemsize                  # inputs + output per feature col
        td = _pick_tile(D, 128, row_bytes, parallel_grid=B)
        grid = (B, -(-D // td))
        in_specs = [pl.BlockSpec((1, t.shape[1], td), lambda b, d: (b, 0, d))
                    for t in tensors]
        out_specs = pl.BlockSpec((1, s_out, td), lambda b, d: (b, 0, d))

    total_in_bytes = sum(int(t.size) * itemsize for t in tensors)
    kernel = functools.partial(_concat_kernel, axis)
    return pl.pallas_call(
        kernel,
        out_shape=jax.ShapeDtypeStruct(out_shape, dtype),
        grid=grid,
        in_specs=in_specs,
        out_specs=out_specs,
        compiler_params=pltpu.CompilerParams(
            dimension_semantics=("parallel", "parallel"),
            vmem_limit_bytes=48 * 1024 * 1024,
        ),
        cost_estimate=pl.CostEstimate(
            flops=0, transcendentals=0, bytes_accessed=2 * total_in_bytes),
    )(*tensors)


class Concat3DConf:
    def __init__(self, concat3D_axis):
        self.concat3D_axis = concat3D_axis


def concat3d_forward(layer_conf, *args):
    """Mirror of Concat3D.forward.

    args: string, string_len, string2, string2_len, ...
    Returns (concatenated tensor, args[1])  -- length of the FIRST input.
    """
    axis = layer_conf.concat3D_axis
    result = []
    if axis == 1:
        for idx, inp in enumerate(args):
            if idx % 2 == 0:
                result.append(inp)
    elif axis == 2:
        input_seq_len = args[0].shape[1]
        for idx, inp in enumerate(args):
            if idx % 2 == 0:
                if input_seq_len != inp.shape[1]:
                    raise Exception(
                        'Concat3D with axis = 2 require that the input '
                        'sequences length should be the same!')
                result.append(inp)
    else:
        raise ValueError('concat3D_axis must be 1 or 2')
    return concat3d_pallas(result, axis), args[1]


if __name__ == "__main__":
    key = jax.random.PRNGKey(0)
    k1, k2, k3, k4, k5 = jax.random.split(key, 5)

    batch, seq = 2, 16

    x1 = jax.random.normal(k1, (batch, seq, 128), dtype=jnp.float32)
    x1_len = jnp.full((batch,), seq, dtype=jnp.int32)
    x2 = jax.random.normal(k2, (batch, seq, 256), dtype=jnp.float32)
    x2_len = jnp.full((batch,), seq, dtype=jnp.int32)
    x3 = jax.random.normal(k3, (batch, seq, 128), dtype=jnp.float32)
    x3_len = jnp.full((batch,), seq, dtype=jnp.int32)

    # --- axis = 2 (concat along feature dim), Pallas path ---
    conf2 = Concat3DConf(concat3D_axis=2)
    out2, out2_len = concat3d_forward(conf2, x1, x1_len, x2, x2_len, x3, x3_len)
    out2 = jax.block_until_ready(out2)
    ref2 = jnp.concatenate([x1, x2, x3], axis=2)
    assert out2.shape == (batch, seq, 128 + 256 + 128)
    assert jnp.array_equal(out2, ref2)
    assert jnp.array_equal(out2_len, x1_len)

    # --- axis = 1 (concat along seq dim; different seq lengths), Pallas path ---
    y = jax.random.normal(k4, (batch, 8, 128), dtype=jnp.float32)
    y_len = jnp.full((batch,), 8, dtype=jnp.int32)
    conf1 = Concat3DConf(concat3D_axis=1)
    out1, out1_len = concat3d_forward(conf1, x1, x1_len, y, y_len)
    out1 = jax.block_until_ready(out1)
    ref1 = jnp.concatenate([x1, y], axis=1)
    assert out1.shape == (batch, seq + 8, 128)
    assert jnp.array_equal(out1, ref1)
    assert jnp.array_equal(out1_len, x1_len)

    # --- bf16, axis = 2 (sublane granule 16), Pallas path ---
    b1 = jax.random.normal(k5, (batch, 32, 128), dtype=jnp.bfloat16)
    b2 = (b1 * jnp.bfloat16(2.0)).astype(jnp.bfloat16)
    b_len = jnp.full((batch,), 32, dtype=jnp.int32)
    outb, outb_len = concat3d_forward(conf2, b1, b_len, b2, b_len)
    outb = jax.block_until_ready(outb)
    assert outb.shape == (batch, 32, 256)
    assert jnp.array_equal(outb, jnp.concatenate([b1, b2], axis=2))
    assert jnp.array_equal(outb_len, b_len)

    # --- odd feature widths (32 + 16): XLA-concat fallback path ---
    s1 = jax.random.normal(k1, (batch, seq, 32), dtype=jnp.float32)
    s2 = jax.random.normal(k2, (batch, seq, 16), dtype=jnp.float32)
    s_len = jnp.full((batch,), seq, dtype=jnp.int32)
    outs, outs_len = concat3d_forward(conf2, s1, s_len, s2, s_len)
    outs = jax.block_until_ready(outs)
    assert outs.shape == (batch, seq, 48)
    assert jnp.array_equal(outs, jnp.concatenate([s1, s2], axis=2))
    assert jnp.array_equal(outs_len, s_len)

    print("KERNEL_OK")
</pallas_src>

<mosaic_0001>
module attributes {stable_mosaic.version = 11 : i64} {
  func.func @_concat_kernel(%arg0: i32, %arg1: i32, %arg2: memref<1x8x128xf32, #tpu.memory_space<vmem>>, %arg3: memref<1x8x256xf32, #tpu.memory_space<vmem>>, %arg4: memref<1x8x128xf32, #tpu.memory_space<vmem>>, %arg5: memref<1x8x512xf32, #tpu.memory_space<vmem>>) attributes {dimension_semantics = [#tpu.dimension_semantics<parallel>, #tpu.dimension_semantics<parallel>], iteration_bounds = array<i64: 2, 2>, scalar_prefetch = 0 : i64, scratch_operands = 0 : i64, tpu.core_type = #tpu.core_type<tc>, window_params = [{transform_indices = @transform_0, window_bounds = array<i64: 1, 8, 128>}, {transform_indices = @transform_1, window_bounds = array<i64: 1, 8, 256>}, {transform_indices = @transform_2, window_bounds = array<i64: 1, 8, 128>}, {transform_indices = @transform_3, window_bounds = array<i64: 1, 8, 512>}]} {
    %c0 = arith.constant 0 : index
    %c0_0 = arith.constant 0 : index
    %c0_1 = arith.constant 0 : index
    %0 = vector.load %arg2[%c0, %c0_0, %c0_1] : memref<1x8x128xf32, #tpu.memory_space<vmem>>, vector<1x8x128xf32>
    %c0_2 = arith.constant 0 : index
    %c0_3 = arith.constant 0 : index
    %c0_4 = arith.constant 0 : index
    %1 = vector.load %arg3[%c0_2, %c0_3, %c0_4] : memref<1x8x256xf32, #tpu.memory_space<vmem>>, vector<1x8x256xf32>
    %c0_5 = arith.constant 0 : index
    %c0_6 = arith.constant 0 : index
    %c0_7 = arith.constant 0 : index
    %2 = vector.load %arg4[%c0_5, %c0_6, %c0_7] : memref<1x8x128xf32, #tpu.memory_space<vmem>>, vector<1x8x128xf32>
    %3 = tpu.concatenate %0, %1, %2 in 2 : vector<1x8x128xf32>, vector<1x8x256xf32>, vector<1x8x128xf32> -> vector<1x8x512xf32>
    %c0_8 = arith.constant 0 : index
    %c0_9 = arith.constant 0 : index
    %c0_10 = arith.constant 0 : index
    %4 = vector.load %arg5[%c0_8, %c0_9, %c0_10] : memref<1x8x512xf32, #tpu.memory_space<vmem>>, vector<1x8x512xf32>
    tpu.vector_store %arg5[%c0_8, %c0_9, %c0_10], %3 {strides = array<i32>} : memref<1x8x512xf32, #tpu.memory_space<vmem>>, vector<1x8x512xf32>,
    return
  }
  func.func @transform_0(%arg0: i32, %arg1: i32) -> (i32, i32, i32) {
    %c0_i32 = arith.constant 0 : i32
    %c0_i32_0 = arith.constant 0 : i32
    return %arg0, %arg1, %c0_i32 : i32, i32, i32
  }
  func.func @transform_1(%arg0: i32, %arg1: i32) -> (i32, i32, i32) {
    %c0_i32 = arith.constant 0 : i32
    %c0_i32_0 = arith.constant 0 : i32
    return %arg0, %arg1, %c0_i32 : i32, i32, i32
  }
  func.func @transform_2(%arg0: i32, %arg1: i32) -> (i32, i32, i32) {
    %c0_i32 = arith.constant 0 : i32
    %c0_i32_0 = arith.constant 0 : i32
    return %arg0, %arg1, %c0_i32 : i32, i32, i32
  }
  func.func @transform_3(%arg0: i32, %arg1: i32) -> (i32, i32, i32) {
    %c0_i32 = arith.constant 0 : i32
    %c0_i32_0 = arith.constant 0 : i32
    return %arg0, %arg1, %c0_i32 : i32, i32, i32
  }
}

</mosaic_0001>

<bundles_post_ra>
// kernel: tpu_custom_call.1
= control target key start
LH: loop header
LB: loop body
LE: loop exit
PB: predicated region body
PF: predicated region fallthrough
CT: control target
= control target key end

     0   :  { %s961_s0 = inlined_call_operand.hbm [shape: f32[2,16,128], index: 0, kind: input, shape index: {}]   ;;  %s962_s1 = inlined_call_operand.hbm [shape: f32[2,16,256], index: 1, kind: input, shape index: {}]   ;;  %s963_s2 = inlined_call_operand.hbm [shape: f32[2,16,128], index: 2, kind: input, shape index: {}]   ;;  %s964_s3 = inlined_call_operand.hbm [shape: f32[2,16,512], index: 3, kind: output, shape index: {}]  }
   0x1   :  { %971 = sst [smem:[#allocation19_spill]] %s962_s1 }
   0x2   :  { %8 = vsyncpa [#allocation3], 0 }
   0x3   :  { %10 = vsyncpa [#allocation3 + $0x1], 0 }
   0x4   :  { %11 = vsyncpa [#allocation6], 0 }
   0x5   :  { %13 = vsyncpa [#allocation6 + $0x1], 0 }
   0x6   :  { %14 = vsyncpa [#allocation4], 0 }
   0x7   :  { %16 = vsyncpa [#allocation4 + $0x1], 0  ;;  %s778_s12 = smov 0   ;;  %s780_s13 = smov 0  }
   0x8   :  { %s782_s14 = smov 0   ;;  %s784_s15 = smov 0  }
   0x9   :  { %s786_s16 = smov 0   ;;  %s788_s17 = smov 0  }
   0xa   :  { %s790_s18 = smov 0   ;;  %s792_s19 = smov 0  }
   0xb LB: > { %972 = sst [smem:[#allocation12_spill]] %s728_s12  ;;  %s819_s20 = sadd.s32 4294967295, %s756_s19   ;;  %s756_s19 = sphi %s792_s19, %s22_s19   ;;  %s752_s18 = sphi %s790_s18, %s992_s18   ;;  %s748_s17 = sphi %s788_s17, %s996_s17   ;;  %s744_s16 = sphi %s786_s16, %s990_s16   ;;  %s740_s15 = sphi %s784_s15, %s995_s15   ;;  %s736_s14 = sphi %s782_s14, %s989_s14   ;;  %s732_s13 = sphi %s780_s13, %s994_s13   ;;  %s728_s12 = sphi %s778_s12, %s993_s12  }
   0xc   : > { %973 = sst [smem:[#allocation13_spill]] %s736_s14  ;;  %s452_s21 = sadd.s32 4294967294, %s756_s19  }
   0xd   : > { %974 = sst [smem:[#allocation14_spill]] %s752_s18  ;;  %s31_s22 = sadd.s32 1, %s748_s17 }
   0xe   : > { %s34_s23 = sadd.s32 1, %s752_s18  ;;  %p32_p0 = scmp.ge.s32.totalorder %s31_s22, 2 }
   0xf   : > { %s43_s24 = sadd.s32 1, %s736_s14  ;;  %p50_p1 = scmp.ne.s32.totalorder %s736_s14, %s732_s13 }
  0x10   : > { %p51_p2 = scmp.eq.s32.totalorder %s756_s19, 0  ;;  %s998_s22 = smov (%p32_p0, %s31_s22), 0 }
  0x11   : > { %975 = sst [smem:[#allocation15_spill]] %s998_s22  ;;  %s1000_s23 = smov (!%p32_p0, %s34_s23), %s752_s18 }
  0x12   : > { %s39_s25 = ssub.s32 %s748_s17, %s998_s22  ;;  %p833_p3 = por %p51_p2, %p50_p1 }
  0x13   : > { %p36_p4 = scmp.ge.s32.totalorder %s1000_s23, 2  ;;  %p56_p5 = scmp.ne.s32.totalorder %s732_s13, %s728_s12 }
  0x14   : > { %p57_p6 = scmp.eq.s32.totalorder %s819_s20, 0  ;;  %p138_p7 = scmp.eq.s32.totalorder %s819_s20, 3 }
  0x15   : > { %s1002_s23 = smov (%p36_p4, %s1000_s23), 0  ;;  %p144_p10 = scmp.eq.s32.totalorder %s452_s21, 3 }
  0x16   : > { %977 = sst [smem:[#allocation16_spill]] %s1002_s23  ;;  %p843_p8 = por %p57_p6, %p56_p5 }
  0x17   : > { %p847_p9 = por %p138_p7, %p50_p1  ;;  %s38_s29 = ssub.s32 %s752_s18, %s1002_s23 }
  0x18   : > { %s40_s30 = sor.u32 %s39_s25, %s38_s29  ;;  %p853_p12 = por %p144_p10, %p56_p5 }
  0x19   : > { %p41_p11 = scmp.eq.s32.totalorder %s40_s30, 0  ;;  %p498_p13 = scmp.lt.s32.totalorder %s756_s19, 4 }
  0x1a   : > { %s980_s4 = scalar_select %p853_p12, 1, 0 }
  0x1b   : > { %s859_s5 = sand.u32 1, %s736_s14   ;;  %p866_p0 = pnand %p498_p13, %p833_p3 }
  0x1c   : > { %981 = sst [smem:[#allocation17_spill]] %s980_s4  ;;  %s185_s8 = sand.u32 1, %s756_s19  }
  0x1d   : > { %s862_s6 = scalar_select %p41_p11, %s736_s14, %s43_s24  }
  0x1e   : > { %s458_s9 = sshll.u32 %s859_s5, 4  ;;  %s459_s10 = sshll.u32 %s748_s17, 1 }
  0x1f   : > { %982 = sst [smem:[#allocation18_spill]] %s862_s6  ;;  %s460_s11 = sshll.u32 %s752_s18, 2 }
  0x20   : > { %s194_s21 = sadd.s32 %s460_s11, %s459_s10  ;;  %s189_s25 = scalar_lea.vmem [#allocation5], %s458_s9 }
  0x21   : > { %s200_s29 = sshll.u32 %s189_s25, 4  ;;  %s461_s30 = sshll.u32 %s194_s21, 3  ;;  %s201_s29 = int_to_ptr.vmem [resolvable:$true] %s200_s29 }
  0x22   : > { %s984_s1 = sld [smem:[#allocation19_spill]]  ;;  %p465_p1 = scmp.ge.s32.totalorder %s756_s19, 1 }
  0x23   : > { %p226_p2 = scmp.lt.s32.totalorder %s756_s19, 5  ;;  %s186_s6 = scalar_lea.sflag [#allocation6], %s185_s8 }
  0x24   : > { %s455_s9 = sshll.u32 %s859_s5, 3  ;;  %s456_s10 = sshll.u32 %s752_s18, 1 }
  0x25   : > { %p881_p3 = pnand %p465_p1, %p226_p2  ;;  %s172_s11 = sadd.s32 %s748_s17, %s456_s10 }
  0x26   : > { %s168_s21 = scalar_lea.vmem [#allocation2], %s455_s9  ;;  %s457_s25 = sshll.u32 %s172_s11, 3 }
  0x27   : > { %s178_s23 = sshll.u32 %s168_s21, 4  ;;  %s165_s12 = scalar_lea.sflag [#allocation3], %s859_s5  ;;  %s179_s23 = int_to_ptr.vmem [resolvable:$true] %s178_s23 }
  0x28   : > { %s196_s26 = scalar_lea.hbm %s984_s1, %s461_s30  ;;  %s211_s10 = scalar_lea.vmem [#allocation7], %s455_s9 }
  0x29   : > { %s198_s22 = sshll.u32 %s196_s26, 4  ;;  %s174_s26 = scalar_lea.hbm %s961_s0, %s457_s25  ;;  %s199_s22 = int_to_ptr.hbm [resolvable:$true] %s198_s22 }
  0x2a   : > { %490 = dma.hbm_to_vmem [thread:$0]  (!%p866_p0), %s199_s22, 256, %s201_s29, %s186_s6  }
  0x2b   : > { %s176_s8 = sshll.u32 %s174_s26, 4  ;;  %s217_s22 = scalar_lea.hbm %s963_s2, %s457_s25  ;;  %s177_s8 = int_to_ptr.hbm [resolvable:$true] %s176_s8 }
  0x2c   : > { %s219_s29 = sshll.u32 %s217_s22, 4  ;;  %s221_s18 = sshll.u32 %s211_s10, 4  ;;  %s220_s29 = int_to_ptr.hbm [resolvable:$true] %s219_s29  ;;  %s222_s18 = int_to_ptr.vmem [resolvable:$true] %s221_s18 }
  0x2d   : > { %487 = dma.hbm_to_vmem [thread:$0]  (!%p866_p0), %s177_s8, 128, %s179_s23, %s165_s12  }
  0x2e   : > { %493 = dma.hbm_to_vmem [thread:$0]  (!%p866_p0), %s220_s29, 128, %s222_s18, %s186_s6  }
  0x2f   : > { %230 = sbr.rel (%p881_p3) target bundleno = 74 (0x4a), region = 32  ;;  %s902_s11 = sand.u32 (!%p881_p3), 1, %s732_s13  }
  0x30   : > { %s466_s1 = sshll.u32 (!%p881_p3), %s902_s11, 3  ;;  %s233_s4 = scalar_lea.sflag (!%p881_p3), [#allocation3], %s902_s11 }
  0x31   : > { %s236_s5 = scalar_lea.vmem (!%p881_p3), [#allocation2], %s466_s1 }
  0x34   : > { %715 = dma.done.wait (%p843_p8), %s233_s4, 128  }
  0x35   : > { %717 = vsyncadd (%p843_p8), %s233_s4, 4294967168  ;;  %s242_s12 = sand.u32 1, %s819_s20   ;;  %s467_s14 = sshll.u32 %s902_s11, 4 }
  0x36   : > { %s243_s18 = scalar_lea.sflag [#allocation6], %s242_s12  ;;  %s246_s6 = scalar_lea.vmem [#allocation5], %s467_s14 }
  0x37   : > { %719 = dma.done.wait (%p843_p8), %s243_s18, 384  }
  0x38   : > { %721 = vsyncadd (%p843_p8), %s243_s18, 4294966912  ;;  %s469_s7 = sshll.u32 %s902_s11, 5  ;;  %s471_s9 = sshll.u32 %s740_s15, 2  ;;  %v290_v0 = vld [vmem:[%s236_s5] sm:$0xff]  ;;  %v291_v1 = vld [vmem:[%s246_s6] sm:$0xff] }
  0x39   : > { %s472_s21 = sshll.u32 %s744_s16, 3  ;;  %s289_s30 = scalar_lea.vmem [#allocation8], %s469_s7  ;;  %v292_v2 = vld [vmem:[%s246_s6 + $0x8] sm:$0xff] }
  0x3a   : > { %s310_s23 = sadd.s32 %s472_s21, %s471_s9  ;;  %s314_s24 = sshll.u32 %s289_s30, 4  ;;  %294 = vst [vmem:[%s289_s30] sm:$0xff] %v290_v0  ;;  %s315_s24 = int_to_ptr.vmem [resolvable:$true] %s314_s24 }
  0x3b   : > { %s473_s25 = sshll.u32 %s310_s23, 3  ;;  %s256_s22 = scalar_lea.vmem [#allocation7], %s466_s1  ;;  %295 = vst [vmem:[%s289_s30 + $0x8] sm:$0xff] %v291_v1 }
  0x3c   : > { %s312_s8 = scalar_lea.hbm %s964_s3, %s473_s25  ;;  %v293_v3 = vld [vmem:[%s256_s22] sm:$0xff]  ;;  %296 = vst [vmem:[%s289_s30 + $0x10] sm:$0xff] %v292_v2  ;;  %s299_s15 = scalar_lea.sflag [#allocation4], %s902_s11 }
  0x3d   : > { %s316_s27 = sshll.u32 %s312_s8, 4  ;;  %297 = vst [vmem:[%s289_s30 + $0x18] sm:$0xff] %v293_v3  ;;  %s674_s5 = scalar_lea.hbm %s964_s3, 128  ;;  %s317_s27 = int_to_ptr.hbm [resolvable:$true] %s316_s27 }
  0x3e   : > { %s668_s16 = sshra.s32 %s317_s27, 4  ;;  %s669_s16 = int_to_ptr.hbm [resolvable:$true] %s668_s16 }
  0x3f   : > { %s670_s29 = scalar_lea.hbm %s669_s16, 32  ;;  %p675_p7 = scmp.lt.s32.totalorder %s669_s16, %s964_s3 }
  0x40   : > { %p671_p4 = scmp.ne.s32.totalorder %s669_s16, %s670_s29  ;;  %p676_p8 = scmp.lt.s32.totalorder %s674_s5, %s670_s29 }
  0x42   : > { %p672_p5 = pnand %p671_p4, %p847_p9  ;;  %p677_p10 = por %p676_p8, %p675_p7 }
  0x44   : > { %p673_p6 = pneg %p672_p5 }
  0x46   : > { %p678_p11 = pnand %p677_p10, %p673_p6 }
  0x48   : > { %681 = shalt.err (!%p678_p11)
}
  0x49   : > { %482 = dma.vmem_to_hbm [thread:$0]  (%p847_p9), %s315_s24, 512, %s317_s27, %s299_s15  }
  0x4a PF: > { %s986_s11 = sld [smem:[#allocation12_spill]]  ;;  %p499_p13 = scmp.ge.s32.totalorder %s756_s19, 2 }
  0x4c   : > { %p495_p0 = pnand %p499_p13, %p853_p12 }
  0x4e   : > { %p496_p1 = pneg %p495_p0 }
  0x50   : > { %s328_s18 = sand.u32 1, %s986_s11  }
  0x51   : > { %s329_s6 = scalar_lea.sflag [#allocation4], %s328_s18 }
  0x52   : > { %723 = dma.done.wait (%p496_p1), %s329_s6, 512  }
  0x53   : > { %725 = vsyncadd (%p496_p1), %s329_s6, 4294966784  ;;  %s22_s19 = sadd.s32 1, %s756_s19   ;;  %s988_s7 = sld [smem:[#allocation13_spill]] }
  0x54   : > { %p19_p2 = scmp.ge.s32.totalorder %s22_s19, 6   ;;  %s989_s14 = sld [smem:[#allocation18_spill]] }
  0x55   : > { %s990_s16 = sld [smem:[#allocation14_spill]]  ;;  %s993_s12 = smov %s732_s13 }
  0x56   : > { %s991_s28 = sld [smem:[#allocation15_spill]]  ;;  %s995_s15 = smov %s748_s17 }
  0x57   : > { %s992_s18 = sld [smem:[#allocation16_spill]] }
  0x58   :  { %21 = sbr.rel (!%p19_p2) target bundleno = 11 (0xb), region = 101 }
  0x59   : > { %s994_s13 = smov %s988_s7 }
  0x5c   : > { %s996_s17 = smov %s991_s28 }
  0x5d   :  { %335 = vsyncpa [#allocation3], 1 }
  0x5e   :  { %337 = vsyncpa [#allocation3 + $0x1], 1 }
  0x5f   :  { %338 = vsyncpa [#allocation6], 1 }
  0x60   :  { %340 = vsyncpa [#allocation6 + $0x1], 1 }
  0x61   :  { %341 = vsyncpa [#allocation4], 1 }
  0x62   :  { %343 = vsyncpa [#allocation4 + $0x1], 1 }

</bundles_post_ra>
